<compile_context>
chip_gen: v5e
topology: v5e:2x2
jax: 0.10.0
libtpu: 0.0.40
codegen_flags: <defaults>
</compile_context>

<pallas_src>
import functools

import jax
import jax.numpy as jnp
from jax.experimental import pallas as pl
from jax.experimental.pallas import tpu as pltpu


def _fused_ensemble_kernel(x_ref, w_ref, b_ref, o_ref):
    # x_ref: (B, D) bf16, w_ref: (D, tn) bf16, b_ref: (1, tn) f32,
    # o_ref: (B, tn) f32.  One fused matmul for the whole ensemble tile.
    y = jnp.dot(x_ref[...], w_ref[...], preferred_element_type=jnp.float32)
    o_ref[...] = (y + b_ref[...]).astype(o_ref.dtype)


def _pick_n_tile(n_pad, cap=512):
    # n_pad is a multiple of 128; pick the largest lane-dense tile <= cap.
    for t in (cap, 256, 128):
        if n_pad % t == 0:
            return t
    return n_pad


@functools.partial(jax.jit, static_argnames=())
def ensemble_forward(x, weights, biases):
    """x: (B, D), weights: (M, C, D), biases: (M, 1, C) -> (B, M, C).

    Matches torch.stack([m(x) for m in models], dim=1) with m = Linear(D, C).
    """
    B, D = x.shape
    M, C, _ = weights.shape
    MC = M * C
    N_pad = pl.cdiv(MC, 128) * 128  # lane-dense output width

    # --- one-time repack (would live at parameter-load time in a real model) ---
    # W_fused[d, m*C + c] = weights[m, c, d]  -> out[b, m*C + c] = x[b] . W_m[c]
    w_fused = jnp.transpose(weights, (2, 0, 1)).reshape(D, MC)
    b_fused = biases.reshape(1, MC)

    # Zero-pad N up to a multiple of 128 (padded columns are sliced off below).
    if N_pad != MC:
        w_fused = jnp.pad(w_fused, ((0, 0), (0, N_pad - MC)))
        b_fused = jnp.pad(b_fused, ((0, 0), (0, N_pad - MC)))

    # bf16 MXU inputs; bias / accumulation / output stay f32.
    x_bf16 = x.astype(jnp.bfloat16)
    w_bf16 = w_fused.astype(jnp.bfloat16)
    b_f32 = b_fused.astype(jnp.float32)

    tn = _pick_n_tile(N_pad)
    grid = (N_pad // tn,)

    out_pad = pl.pallas_call(
        _fused_ensemble_kernel,
        out_shape=jax.ShapeDtypeStruct((B, N_pad), jnp.float32),
        grid_spec=pltpu.PrefetchScalarGridSpec(
            num_scalar_prefetch=0,
            grid=grid,
            in_specs=[
                # x is the same block every step; Pallas skips the re-DMA.
                pl.BlockSpec((B, D), lambda j: (0, 0)),
                pl.BlockSpec((D, tn), lambda j: (0, j)),
                pl.BlockSpec((1, tn), lambda j: (0, j)),
            ],
            out_specs=pl.BlockSpec((B, tn), lambda j: (0, j)),
        ),
        compiler_params=pltpu.CompilerParams(
            dimension_semantics=("parallel",),
        ),
    )(x_bf16, w_bf16, b_f32)

    # Drop padded columns; reshape is a free row-major view -> (B, M, C),
    # exactly torch.stack(outputs, dim=1) ordering.
    return out_pad[:, :MC].reshape(B, M, C).astype(x.dtype)


def ensemble_reference(x, weights, biases):
    outs = [x @ weights[m].T + biases[m, 0] for m in range(weights.shape[0])]
    return jnp.stack(outs, axis=1)


if __name__ == "__main__":
    # Small shapes: batch=2, in_features=32, num_classes=16, num_models=3.
    B, D, C, M = 2, 32, 16, 3

    key = jax.random.PRNGKey(0)
    kx, kw, kb = jax.random.split(key, 3)
    x = jax.random.normal(kx, (B, D), dtype=jnp.float32)
    weights = jax.random.normal(kw, (M, C, D), dtype=jnp.float32) * 0.1
    biases = jax.random.normal(kb, (M, 1, C), dtype=jnp.float32) * 0.1

    out = ensemble_forward(x, weights, biases)
    out = jax.block_until_ready(out)

    ref = ensemble_reference(x, weights, biases)
    assert out.shape == (B, M, C), out.shape
    # bf16 MXU inputs, f32 accumulation -> relaxed tolerance vs f32 reference.
    assert jnp.allclose(out, ref, atol=2e-2, rtol=2e-2), "mismatch vs reference"

    print("KERNEL_OK")
</pallas_src>

<mosaic_0001>
module attributes {stable_mosaic.version = 11 : i64} {
  func.func @_fused_ensemble_kernel(%arg0: i32, %arg1: memref<2x32xbf16, #tpu.memory_space<vmem>>, %arg2: memref<32x128xbf16, #tpu.memory_space<vmem>>, %arg3: memref<1x128xf32, #tpu.memory_space<vmem>>, %arg4: memref<2x128xf32, #tpu.memory_space<vmem>>) attributes {dimension_semantics = [#tpu.dimension_semantics<parallel>], iteration_bounds = array<i64: 1>, scalar_prefetch = 0 : i64, scratch_operands = 0 : i64, tpu.core_type = #tpu.core_type<tc>, window_params = [{pipeline_mode = #tpu.pipeline_mode<synchronous>, transform_indices = @transform_0, window_bounds = array<i64: 2, 32>}, {transform_indices = @transform_1, window_bounds = array<i64: 32, 128>}, {transform_indices = @transform_2, window_bounds = array<i64: 1, 128>}, {transform_indices = @transform_3, window_bounds = array<i64: 2, 128>}]} {
    %c0 = arith.constant 0 : index
    %c0_0 = arith.constant 0 : index
    %0 = vector.load %arg1[%c0, %c0_0] : memref<2x32xbf16, #tpu.memory_space<vmem>>, vector<2x32xbf16>
    %c0_1 = arith.constant 0 : index
    %c0_2 = arith.constant 0 : index
    %1 = vector.load %arg2[%c0_1, %c0_2] : memref<32x128xbf16, #tpu.memory_space<vmem>>, vector<32x128xbf16>
    %cst = arith.constant dense<0.000000e+00> : vector<2x128xf32>
    %2 = tpu.matmul %0, %1, %cst {dimension_numbers = #tpu.dot_dimension_numbers<[1], [0], [0], [1], [0, 0, 1, 1], [], []>} : vector<2x32xbf16>, vector<32x128xbf16>, vector<2x128xf32> -> vector<2x128xf32>
    %c0_3 = arith.constant 0 : index
    %c0_4 = arith.constant 0 : index
    %3 = vector.load %arg3[%c0_3, %c0_4] : memref<1x128xf32, #tpu.memory_space<vmem>>, vector<1x128xf32>
    %4 = vector.broadcast %3 : vector<1x128xf32> to vector<2x128xf32>
    %5 = arith.addf %2, %4 : vector<2x128xf32>
    %c0_5 = arith.constant 0 : index
    %c0_6 = arith.constant 0 : index
    %6 = vector.load %arg4[%c0_5, %c0_6] : memref<2x128xf32, #tpu.memory_space<vmem>>, vector<2x128xf32>
    tpu.vector_store %arg4[%c0_5, %c0_6], %5 {strides = array<i32>} : memref<2x128xf32, #tpu.memory_space<vmem>>, vector<2x128xf32>,
    return
  }
  func.func @transform_0(%arg0: i32) -> (i32, i32) {
    %c0_i32 = arith.constant 0 : i32
    %c0_i32_0 = arith.constant 0 : i32
    %c0_i32_1 = arith.constant 0 : i32
    return %c0_i32, %c0_i32_0 : i32, i32
  }
  func.func @transform_1(%arg0: i32) -> (i32, i32) {
    %c0_i32 = arith.constant 0 : i32
    %c0_i32_0 = arith.constant 0 : i32
    return %c0_i32, %arg0 : i32, i32
  }
  func.func @transform_2(%arg0: i32) -> (i32, i32) {
    %c0_i32 = arith.constant 0 : i32
    %c0_i32_0 = arith.constant 0 : i32
    return %c0_i32, %arg0 : i32, i32
  }
  func.func @transform_3(%arg0: i32) -> (i32, i32) {
    %c0_i32 = arith.constant 0 : i32
    %c0_i32_0 = arith.constant 0 : i32
    return %c0_i32, %arg0 : i32, i32
  }
}

</mosaic_0001>

<bundles_post_ra>
// kernel: ensemble_forward.1
= control target key start
LH: loop header
LB: loop body
LE: loop exit
PB: predicated region body
PF: predicated region fallthrough
CT: control target
= control target key end

     0   :  { %vm36_vm0 = vcmask 261120   ;;  %s105_s1 = inlined_call_operand.vmem [shape: bf16[32,128], index: 1, kind: input, shape index: {}]   ;;  %s106_s2 = inlined_call_operand.vmem [shape: f32[1,128], index: 2, kind: input, shape index: {}]   ;;  %s107_s0 = inlined_call_operand.vmem [shape: bf16[2,32], index: 0, kind: input, shape index: {}]   ;;  %s108_s3 = inlined_call_operand.vmem [shape: f32[2,128], index: 3, kind: output, shape index: {}]  }
   0x1   :  { %v68_v0 = vld [vmem:[%s105_s1 + $0x8] sm:$0xff]  ;;  %v67_v1 = vld [vmem:[%s105_s1] sm:$0xff] }
   0x2   :  { %46 = vmatpush.bf16.msra.mxu0 %v68_v0  ;;  %v15_v2 = vld [vmem:[%s107_s0] sm:$0x1] }
   0x3   :  { %v69_v3 = vld [vmem:[%s106_s2] ss:$0 sm:$0xff] }
   0x6   :  { %47 = vmatpush.bf16.msra.mxu0 %v67_v1 }
   0x9   :  { %66 = vmatmul.msk.bf16.vlgmr.msra.gmra.mxu0 %vm36_vm0, %v15_v2 }
  0x86   :  { %v49_v4 = vpop.f32.mrf.mxu0 }
  0x87   :  { %v50_v5 = vadd.f32 %v69_v3, %v49_v4 }
  0x89   :  { %53 = vst [vmem:[%s108_s3] sm:$0x3] %v50_v5 }
  0x8e   :  { %v51_v6 = vpop.f32.mrf.mxu0 }

</bundles_post_ra>
